<compile_context>
chip_gen: v6e
topology: v6e:2x2x1
jax: 0.10.0
libtpu: 0.0.40
codegen_flags: <defaults>
</compile_context>

<pallas_src>
import functools
import math

import jax
import jax.numpy as jnp
from jax import lax
from jax.experimental import pallas as pl
from jax.experimental.pallas import tpu as pltpu


def _round_up(x, m):
    return (x + m - 1) // m * m


def _scorer_kernel(q_ref, wt_ref, b_ref, v_ref, o_ref, *, inv_sqrt_dk):
    # q_ref : (tm, d_q)   tile of flattened queries (compute dtype)
    # wt_ref: (d_q, H)    W^T, resident across the grid
    # b_ref : (1, H)      bias (f32)
    # v_ref : (1, H)      v    (f32)
    # o_ref : (1, 1, tm)  lane-dense per-row scores
    h = jnp.dot(q_ref[...], wt_ref[...], preferred_element_type=jnp.float32)
    h = jnp.tanh(h + b_ref[...])                        # f32 bias + tanh (VPU/EUP)
    # (1,H) contracted with (tm,H) over H -> (1,tm): lane-dense result; avoids
    # an N=1 MXU matmul and masked partial stores on the output.
    s = lax.dot_general(v_ref[...], h,
                        dimension_numbers=(((1,), (1,)), ((), ())),
                        preferred_element_type=jnp.float32)
    o_ref[...] = ((s * inv_sqrt_dk)[None]).astype(o_ref.dtype)


def self_additive_scorer(query, keys, W, b, v, *, tm=512,
                         compute_dtype=jnp.float32):
    """query: (bs, ..., T, d_q), keys: (bs, ..., S, d_k), W: (H, d_q),
    b: (H,), v: (1, H).  Returns scores of shape (bs, ..., T)."""
    lead_shape = query.shape[:-1]
    d_q = query.shape[-1]
    H = W.shape[0]
    d_k = keys.shape[-1]
    M = 1
    for s in lead_shape:
        M *= int(s)

    in_bytes = jnp.dtype(compute_dtype).itemsize
    out_dtype = query.dtype
    out_bytes = jnp.dtype(out_dtype).itemsize

    # ---- choose the row tile ------------------------------------------------
    tm_eff = max(8, min(_round_up(tm, 8), _round_up(M, 8)))

    def vmem_need(t):
        need = 2 * t * d_q * in_bytes          # q tile, double-buffered
        need += 2 * d_q * H * in_bytes         # resident W^T (double-buffered)
        need += 2 * 2 * H * 4                  # bias + v (f32)
        need += 2 * t * out_bytes              # output tile, double-buffered
        return need

    vmem_budget = 40 * 1024 * 1024             # safe on v5e/v6e (128M) & v7x (64M)
    while tm_eff > 8 and vmem_need(tm_eff) > vmem_budget:
        tm_eff = max(8, _round_up(tm_eff // 2, 8))

    # Keep >= 2 grid steps when possible so v7x can shard the "parallel" axis
    # across both TensorCores.
    if M > 8 and _round_up(M, tm_eff) // tm_eff < 2:
        tm_eff = max(8, _round_up(-(-M // 2), 8))

    m_pad = _round_up(M, tm_eff)
    num_tiles = m_pad // tm_eff

    # ---- plain-JAX glue -----------------------------------------------------
    q2d = query.reshape(M, d_q)
    if m_pad > M:                               # pad tail rows (sliced off below)
        q2d = jnp.pad(q2d, ((0, m_pad - M), (0, 0)))
    q2d = q2d.astype(compute_dtype)
    wt = W.T.astype(compute_dtype)              # (d_q, H)
    b2d = b.reshape(1, H).astype(jnp.float32)
    v2d = v.reshape(1, H).astype(jnp.float32)

    kernel = functools.partial(_scorer_kernel, inv_sqrt_dk=1.0 / math.sqrt(d_k))

    vmem_limit = int(min(max(2 * vmem_need(tm_eff), 32 * 1024 * 1024),
                         48 * 1024 * 1024))

    out3d = pl.pallas_call(
        kernel,
        out_shape=jax.ShapeDtypeStruct((num_tiles, 1, tm_eff), out_dtype),
        grid_spec=pltpu.PrefetchScalarGridSpec(
            num_scalar_prefetch=0,
            grid=(num_tiles,),
            in_specs=[
                pl.BlockSpec((tm_eff, d_q), lambda i: (i, 0)),   # query tile
                pl.BlockSpec((d_q, H), lambda i: (0, 0)),        # W^T (resident)
                pl.BlockSpec((1, H), lambda i: (0, 0)),          # bias
                pl.BlockSpec((1, H), lambda i: (0, 0)),          # v
            ],
            out_specs=pl.BlockSpec((1, 1, tm_eff), lambda i: (i, 0, 0)),
        ),
        compiler_params=pltpu.CompilerParams(
            dimension_semantics=("parallel",),
            vmem_limit_bytes=vmem_limit),
    )(q2d, wt, b2d, v2d)

    return out3d.reshape(m_pad)[:M].reshape(lead_shape)


def _init_params(key, vector_size, attn_hidden_size, dtype=jnp.float32):
    """Deterministic re-implementation of the module's init_weights()."""
    k_w, k_b, k_v = jax.random.split(key, 3)
    # kaiming_uniform_ with a=sqrt(5)  ->  bound = 1/sqrt(fan_in)
    w_bound = 1.0 / math.sqrt(vector_size)
    W = jax.random.uniform(k_w, (attn_hidden_size, vector_size),
                           minval=-w_bound, maxval=w_bound, dtype=dtype)
    b_bound = 1.0 / math.sqrt(vector_size)
    b = jax.random.uniform(k_b, (attn_hidden_size,),
                           minval=-b_bound, maxval=b_bound, dtype=dtype)
    v_bound = 1.0 / math.sqrt(attn_hidden_size)
    v = jax.random.uniform(k_v, (1, attn_hidden_size),
                           minval=-v_bound, maxval=v_bound, dtype=dtype)
    return W, b, v


def _ref_scorer(query, keys, W, b, v):
    x = jnp.tanh(query @ W.T + b)
    score = (x @ v.reshape(1, -1).T)[..., 0]
    return score / math.sqrt(keys.shape[-1])


if __name__ == "__main__":
    key = jax.random.PRNGKey(0)
    k_q, k_k, k_p, k_q2, k_k2, k_p2 = jax.random.split(key, 6)

    # Case 1: module-default-ish small shapes, f32 (tight tolerance).
    bs, T, S, d_q, hidden = 2, 8, 8, 32, 32
    query = jax.random.normal(k_q, (bs, T, d_q), dtype=jnp.float32)
    keys = jax.random.normal(k_k, (bs, S, d_q), dtype=jnp.float32)
    W, b, v = _init_params(k_p, d_q, hidden)

    out = jax.block_until_ready(self_additive_scorer(query, keys, W, b, v))
    ref = _ref_scorer(query, keys, W, b, v)
    assert out.shape == (bs, T)
    assert jnp.allclose(out, ref, atol=1e-5, rtol=1e-5)

    # Case 2: ragged M (exercises tail padding + multi-step grid), f32.
    bs2, T2, S2, d_q2, hidden2 = 3, 75, 10, 64, 48
    query2 = jax.random.normal(k_q2, (bs2, T2, d_q2), dtype=jnp.float32)
    keys2 = jax.random.normal(k_k2, (bs2, S2, d_q2), dtype=jnp.float32)
    W2, b2, v2 = _init_params(k_p2, d_q2, hidden2)
    out2 = jax.block_until_ready(self_additive_scorer(query2, keys2, W2, b2, v2))
    ref2 = _ref_scorer(query2, keys2, W2, b2, v2)
    assert out2.shape == (bs2, T2)
    assert jnp.allclose(out2, ref2, atol=1e-5, rtol=1e-5)

    # Case 3: bf16 MXU inputs (recommended path on v6e/v7x), looser tolerance.
    out3 = jax.block_until_ready(
        self_additive_scorer(query, keys, W, b, v, compute_dtype=jnp.bfloat16))
    assert out3.shape == (bs, T)
    assert jnp.allclose(out3, ref, atol=1e-1, rtol=1e-1)

    print("KERNEL_OK")
</pallas_src>

<mosaic_0001>
module attributes {stable_mosaic.version = 11 : i64} {
  func.func @_scorer_kernel(%arg0: i32, %arg1: memref<8x32xf32, #tpu.memory_space<vmem>>, %arg2: memref<32x32xf32, #tpu.memory_space<vmem>>, %arg3: memref<1x32xf32, #tpu.memory_space<vmem>>, %arg4: memref<1x32xf32, #tpu.memory_space<vmem>>, %arg5: memref<1x1x8xf32, #tpu.memory_space<vmem>>) attributes {dimension_semantics = [#tpu.dimension_semantics<parallel>], iteration_bounds = array<i64: 2>, scalar_prefetch = 0 : i64, scratch_operands = 0 : i64, tpu.core_type = #tpu.core_type<tc>, window_params = [{transform_indices = @transform_0, window_bounds = array<i64: 8, 32>}, {pipeline_mode = #tpu.pipeline_mode<synchronous>, transform_indices = @transform_1, window_bounds = array<i64: 32, 32>}, {pipeline_mode = #tpu.pipeline_mode<synchronous>, transform_indices = @transform_2, window_bounds = array<i64: 1, 32>}, {pipeline_mode = #tpu.pipeline_mode<synchronous>, transform_indices = @transform_3, window_bounds = array<i64: 1, 32>}, {transform_indices = @transform_4, window_bounds = array<i64: 1, 1, 8>}]} {
    %c0 = arith.constant 0 : index
    %c0_0 = arith.constant 0 : index
    %0 = vector.load %arg1[%c0, %c0_0] : memref<8x32xf32, #tpu.memory_space<vmem>>, vector<8x32xf32>
    %c0_1 = arith.constant 0 : index
    %c0_2 = arith.constant 0 : index
    %1 = vector.load %arg2[%c0_1, %c0_2] : memref<32x32xf32, #tpu.memory_space<vmem>>, vector<32x32xf32>
    %cst = arith.constant dense<0.000000e+00> : vector<8x32xf32>
    %2 = tpu.matmul %0, %1, %cst {dimension_numbers = #tpu.dot_dimension_numbers<[1], [0], [0], [1], [0, 0, 1, 1], [], []>} : vector<8x32xf32>, vector<32x32xf32>, vector<8x32xf32> -> vector<8x32xf32>
    %c0_3 = arith.constant 0 : index
    %c0_4 = arith.constant 0 : index
    %3 = vector.load %arg3[%c0_3, %c0_4] : memref<1x32xf32, #tpu.memory_space<vmem>>, vector<1x32xf32>
    %4 = vector.broadcast %3 : vector<1x32xf32> to vector<8x32xf32>
    %5 = arith.addf %2, %4 : vector<8x32xf32>
    %6 = math.tanh %5 : vector<8x32xf32>
    %c0_5 = arith.constant 0 : index
    %c0_6 = arith.constant 0 : index
    %7 = vector.load %arg4[%c0_5, %c0_6] : memref<1x32xf32, #tpu.memory_space<vmem>>, vector<1x32xf32>
    %cst_7 = arith.constant dense<0.000000e+00> : vector<1x8xf32>
    %8 = tpu.matmul %7, %6, %cst_7 {dimension_numbers = #tpu.dot_dimension_numbers<[1], [1], [0], [0], [0, 0, 1, 0], [], []>} : vector<1x32xf32>, vector<8x32xf32>, vector<1x8xf32> -> vector<1x8xf32>
    %cst_8 = arith.constant 0.176776692 : f32
    %9 = vector.broadcast %cst_8 : f32 to vector<1x8xf32>
    %10 = arith.mulf %8, %9 : vector<1x8xf32>
    %11 = vector.shape_cast %10 : vector<1x8xf32> to vector<1x1x8xf32>
    %c0_9 = arith.constant 0 : index
    %c0_10 = arith.constant 0 : index
    %c0_11 = arith.constant 0 : index
    %12 = vector.load %arg5[%c0_9, %c0_10, %c0_11] : memref<1x1x8xf32, #tpu.memory_space<vmem>>, vector<1x1x8xf32>
    tpu.vector_store %arg5[%c0_9, %c0_10, %c0_11], %11 {strides = array<i32>} : memref<1x1x8xf32, #tpu.memory_space<vmem>>, vector<1x1x8xf32>,
    return
  }
  func.func @transform_0(%arg0: i32) -> (i32, i32) {
    %c0_i32 = arith.constant 0 : i32
    %c0_i32_0 = arith.constant 0 : i32
    return %arg0, %c0_i32 : i32, i32
  }
  func.func @transform_1(%arg0: i32) -> (i32, i32) {
    %c0_i32 = arith.constant 0 : i32
    %c0_i32_0 = arith.constant 0 : i32
    %c0_i32_1 = arith.constant 0 : i32
    return %c0_i32, %c0_i32_0 : i32, i32
  }
  func.func @transform_2(%arg0: i32) -> (i32, i32) {
    %c0_i32 = arith.constant 0 : i32
    %c0_i32_0 = arith.constant 0 : i32
    %c0_i32_1 = arith.constant 0 : i32
    return %c0_i32, %c0_i32_0 : i32, i32
  }
  func.func @transform_3(%arg0: i32) -> (i32, i32) {
    %c0_i32 = arith.constant 0 : i32
    %c0_i32_0 = arith.constant 0 : i32
    %c0_i32_1 = arith.constant 0 : i32
    return %c0_i32, %c0_i32_0 : i32, i32
  }
  func.func @transform_4(%arg0: i32) -> (i32, i32, i32) {
    %c0_i32 = arith.constant 0 : i32
    %c0_i32_0 = arith.constant 0 : i32
    %c0_i32_1 = arith.constant 0 : i32
    return %arg0, %c0_i32, %c0_i32_0 : i32, i32, i32
  }
}

</mosaic_0001>

<bundles_post_ra>
// kernel: tpu_custom_call.1
= control target key start
LH: loop header
LB: loop body
LE: loop exit
PB: predicated region body
PF: predicated region fallthrough
CT: control target
= control target key end

     0   :  { %9 = vsyncpa [#allocation3], 0  ;;  %s908_s0 = inlined_call_operand.hbm [shape: f32[16,32], index: 0, kind: input, shape index: {}]   ;;  %s909_s1 = inlined_call_operand.hbm [shape: f32[32,32], index: 1, kind: input, shape index: {}]   ;;  %s910_s2 = inlined_call_operand.vmem [shape: f32[1,32], index: 2, kind: input, shape index: {}]   ;;  %s911_s3 = inlined_call_operand.vmem [shape: f32[1,32], index: 3, kind: input, shape index: {}]   ;;  %s912_s4 = inlined_call_operand.hbm [shape: f32[2,1,8], index: 4, kind: output, shape index: {}]  }
   0x1   :  { %11 = vsyncpa [#allocation3 + $0x1], 0 }
   0x2   :  { %12 = vsyncpa [#allocation6], 0 }
   0x3   :  { %13 = vsyncpa [#allocation4], 0 }
   0x4   :  { %15 = vsyncpa [#allocation4 + $0x1], 0  ;;  %s741_s15 = smov 0   ;;  %s743_s16 = smov 0  }
   0x5   :  { %s745_s17 = smov 0   ;;  %s747_s18 = smov 0  }
   0x6 LB: > { %s762_s19 = sadd.s32 4294967295, %s707_s18   ;;  %s483_s20 = sadd.s32 4294967294, %s707_s18   ;;  %s707_s18 = sphi %s747_s18, %s934_s18   ;;  %s703_s17 = sphi %s745_s17, %s933_s17   ;;  %s699_s16 = sphi %s743_s16, %s932_s16   ;;  %s695_s15 = sphi %s741_s15, %s931_s15  }
   0x7   : > { %p41_p0 = scmp.ne.s32.totalorder %s699_s16, %s695_s15  ;;  %p913_p1 = scmp.eq.s32.totalorder %s762_s19, 0 }
   0x8   : > { %p134_p3 = scmp.eq.s32.totalorder %s483_s20, 1  ;;  %p484_p5 = scmp.ge.s32.totalorder %s707_s18, 1 }
   0x9   : > { %p771_p4 = por %p913_p1, %p41_p0  ;;  %p141_p7 = scmp.lt.s32.totalorder %s707_s18, 3 }
   0xa   : > { %p776_p6 = por %p134_p3, %p41_p0  ;;  %s709_s24 = smov [#allocation5]  }
   0xb   : > { %s917_s21 = scalar_select %p771_p4, 1, 0 }
   0xc   : > { %s918_s22 = scalar_select %p776_p6, 1, 0 }
   0xd   : > { %p781_p8 = pnand %p484_p5, %p141_p7  ;;  %s153_s25 = sshll.u32 %s709_s24, 4  ;;  %s154_s25 = int_to_ptr.vmem [resolvable:$true] %s153_s25 }
   0xe   : > { %s795_s27 = sadd.s32 1, %s707_s18   ;;  %s28_s28 = sadd.s32 1, %s703_s17 }
   0xf   : > { %s919_s23 = scalar_select %p781_p8, 1, 0 }
  0x10   : > { %p530_p9 = pneg %p781_p8  ;;  %s25_s29 = ssub.s32 %s707_s18, %s795_s27 }
  0x11   : > { %s596_s30 = scalar_lea.vmem %s154_s25, 512  ;;  %p604_p5 = scmp.lt.s32.totalorder %s154_s25, %s154_s25 }
  0x12   : > { %p790_p11 = pnand %p530_p9, %p913_p1  ;;  %p597_p13 = scmp.ne.s32.totalorder %s154_s25, %s596_s30 }
  0x13   : > { %p605_p7 = scmp.lt.s32.totalorder %s596_s30, %s596_s30 }
  0x14   : > { %p587_p12 = pneg %p790_p11 }
  0x15   : > { %p606_p10 = por %p605_p7, %p604_p5 }
  0x16   : > { %p599_p0 = pnand %p597_p13, %p587_p12 }
  0x18   : > { %p600_p3 = pneg %p599_p0 }
  0x1a   : > { %p607_p2 = pnand %p606_p10, %p600_p3 }
  0x1c   : > { %610 = shalt.err (!%p607_p2)
}
  0x1d   : > { %s710_s5 = smov 128   ;;  %s711_s6 = smov 8  }
  0x1e   : > { %533 = dma.hbm_to_vmem [thread:$0]  (!%p790_p11), %s909_s1, 512, %s154_s25, [#allocation6], %s710_s5, %s710_s5, %s711_s6  }
  0x1f   : > { %p26_p9 = scmp.eq.s32.totalorder %s25_s29, 0  ;;  %p35_p12 = scmp.ne.s32.totalorder %s703_s17, %s699_s16 }
  0x20   : > { %p36_p10 = scmp.eq.s32.totalorder %s707_s18, 0  ;;  %p543_p2 = scmp.lt.s32.totalorder %s707_s18, 2 }
  0x21   : > { %s812_s9 = scalar_select %p26_p9, %s703_s17, %s28_s28  }
  0x22   : > { %p37_p13 = por %p36_p10, %p35_p12  ;;  %p921_p0 = scmp.eq.s32.totalorder %s762_s19, 1 }
  0x23   : > { %s173_s11 = sand.u32 1, %s703_s17   ;;  %s488_s12 = sshll.u32 %s707_s18, 7 }
  0x24   : > { %p816_p3 = por %p921_p0, %p35_p12  ;;  %s487_s13 = sshll.u32 %s173_s11, 3 }
  0x25   : > { %s825_s24 = scalar_lea.hbm %s908_s0, %s488_s12  ;;  %s177_s25 = scalar_lea.vmem [#allocation2], %s487_s13 }
  0x26   : > { %s922_s10 = scalar_select %p816_p3, 1, 0 }
  0x27   : > { %s184_s26 = sshll.u32 %s177_s25, 4  ;;  %p827_p11 = pnand %p543_p2, %p37_p13  ;;  %s185_s26 = int_to_ptr.vmem [resolvable:$true] %s184_s26 }
  0x28   : > { %s174_s29 = scalar_lea.sflag [#allocation3], %s173_s11  ;;  %s611_s30 = scalar_lea.hbm %s825_s24, 128 }
  0x29   : > { %p612_p5 = scmp.ne.s32.totalorder %s825_s24, %s611_s30  ;;  %p613_p7 = pneg %p827_p11 }
  0x2a   : > { %s616_s7 = scalar_lea.hbm %s908_s0, 256  ;;  %p617_p10 = scmp.lt.s32.totalorder %s825_s24, %s908_s0 }
  0x2b   : > { %p614_p9 = pnand %p613_p7, %p612_p5  ;;  %p618_p2 = scmp.lt.s32.totalorder %s616_s7, %s611_s30 }
  0x2d   : > { %p615_p12 = pneg %p614_p9  ;;  %p619_p13 = por %p618_p2, %p617_p10 }
  0x2f   : > { %p620_p0 = pnand %p619_p13, %p615_p12 }
  0x31   : > { %623 = shalt.err (!%p620_p0)
}
  0x32   : > { %s624_s13 = scalar_lea.vmem %s185_s26, 128  ;;  %s712_s11 = smov [#allocation2]  }
  0x33   : > { %p625_p1 = scmp.ne.s32.totalorder %s185_s26, %s624_s13  ;;  %s629_s14 = sshll.u32 %s712_s11, 4  ;;  %s630_s14 = int_to_ptr.vmem [resolvable:$false] %s629_s14 }
  0x34   : > { %s631_s20 = scalar_lea.vmem %s630_s14, 256  ;;  %p632_p5 = scmp.lt.s32.totalorder %s185_s26, %s630_s14 }
  0x35   : > { %p627_p6 = pnand %p625_p1, %p613_p7  ;;  %p633_p9 = scmp.lt.s32.totalorder %s631_s20, %s624_s13 }
  0x37   : > { %p628_p3 = pneg %p627_p6  ;;  %p634_p4 = por %p633_p9, %p632_p5 }
  0x39   : > { %p635_p8 = pnand %p634_p4, %p628_p3 }
  0x3b   : > { %638 = shalt.err (!%p635_p8)
}
  0x3c   : > { %537 = dma.hbm_to_vmem [thread:$0]  (!%p827_p11), %s825_s24, 128, %s185_s26, %s174_s29  }
  0x3d   : > { %p924_p12 = scmp.ne.s32.totalorder %s919_s23, 0 }
  0x3e   : > { %s848_s25 = sand.u32 (!%p924_p12), 1, %s699_s16   ;;  %p925_p1 = scmp.ne.s32.totalorder (!%p924_p12), %s917_s21, 0 }
  0x3f   : > { %193 = sbr.rel (%p924_p12) target bundleno = 502 (0x1f6), region = 36  ;;  %s490_s30 = sshll.u32 (!%p924_p12), %s848_s25, 3 }
  0x40   : > { %s196_s5 = scalar_lea.sflag (!%p924_p12), [#allocation3], %s848_s25  ;;  %s199_s6 = scalar_lea.vmem (!%p924_p12), [#allocation2], %s490_s30 }
  0x44   : > { %682 = dma.done.wait (%p925_p1), %s196_s5, 128  }
  0x45   : > { %684 = vsyncadd (%p925_p1), %s196_s5, 4294967168  ;;  %p926_p4 = scmp.eq.s32.totalorder %s762_s19, 0 }
  0x47   : > { %686 = dma.done.wait (%p926_p4), [#allocation6], 512   ;;  %p927_p6 = pmov %p926_p4 }
  0x48   : > { %v713_v0 = vmov 0.0   ;;  %vm714_vm0 = vmmov 0   ;;  %v231_v1 = vld [vmem:[#allocation5 + $0x18] sm:$0xff]  ;;  %v230_v2 = vld [vmem:[#allocation5 + $0x10] sm:$0xff]  ;;  %v229_v3 = vld [vmem:[#allocation5 + $0x8] sm:$0xff]  ;;  %vm239_vm1 = vcmask 261120  }
  0x49   : > { %688 = vsyncadd (%p927_p6), [#allocation6], 4294966784  ;;  %506 = vmatprep.subr.mxu0 %v713_v0  ;;  %514 = vmatprep.mubr.msk.f32.mxu0 %vm714_vm0, %v713_v0  ;;  %v228_v4 = vld [vmem:[#allocation5] sm:$0xff]  ;;  %v227_v5 = vld [vmem:[%s199_s6] sm:$0xff]  ;;  %s496_s28 = sshll.u32 %s762_s19, 4  ;;  %s226_s29 = scalar_lea.vmem [#allocation7], %s848_s25 }
  0x4a   : > { %517 = vmatprep.subr.mxu1 %v713_v0  ;;  %519 = vmatprep.mubr.msk.f32.mxu1 %vm714_vm0, %v713_v0  ;;  %v492_v6 = vld [vmem:[%s910_s2] ss:$0 sm:$0xff]  ;;  %s407_s7 = sshll.u32 %s226_s29, 4  ;;  %vm392_vm2 = vcmask 57344   ;;  %s871_s13 = scalar_lea.hbm %s912_s4, %s496_s28  ;;  %s408_s7 = int_to_ptr.vmem [resolvable:$true] %s407_s7 }
  0x4b   : > { %507 = vmatpush3.msra.mxu0 %v231_v1  ;;  %v314_v11 = vld [vmem:[%s911_s3] sm:$0x1]  ;;  %s395_s11 = scalar_lea.sflag [#allocation4], %s848_s25  ;;  %s639_s14 = scalar_lea.vmem %s408_s7, 16 }
  0x4c   : > { %508 = vmatprep.subr.mxu0 %v713_v0  ;;  %p640_p8 = scmp.ne.s32.totalorder %s408_s7, %s639_s14  ;;  %p928_p3 = scmp.ne.s32.totalorder %s922_s10, 0 }
  0x4d   : > { %509 = vmatpush3.msra.mxu0 %v230_v2  ;;  %s715_s19 = smov [#allocation7]  }
  0x4e   : > { %510 = vmatprep.subr.mxu0 %v713_v0  ;;  %p641_p11 = pnand %p640_p8, %p928_p3  ;;  %s643_s20 = sshll.u32 %s715_s19, 4  ;;  %s644_s20 = int_to_ptr.vmem [resolvable:$false] %s643_s20 }
  0x4f   : > { %511 = vmatpush3.msra.mxu0 %v229_v3  ;;  %s645_s30 = scalar_lea.vmem %s644_s20, 32  ;;  %p646_p10 = scmp.lt.s32.totalorder %s408_s7, %s644_s20 }
  0x50   : > { %512 = vmatprep.subr.mxu0 %v713_v0  ;;  %p642_p7 = pneg %p641_p11  ;;  %p647_p2 = scmp.lt.s32.totalorder %s645_s30, %s639_s14 }
  0x51   : > { %513 = vmatpush3.msra.mxu0 %v228_v4 }
  0x52   : > { %515 = vmatmul.mubr.msk.f32.vlgmr.msra.gmra.mxu0 %vm239_vm1, %v227_v5  ;;  %p648_p13 = por %p647_p2, %p646_p10 }
  0x54   : > { %p649_p0 = pnand %p648_p13, %p642_p7 }
 0x112   : > { %v309_v7 = vpop.f32.mrf.mxu0 }
 0x113   : > { %v310_v8 = vadd.f32 %v492_v6, %v309_v7 }
 0x114   : > { %v516_v9 = vpop.f32.mrf.mxu0 }
 0x115   : > { %583 = vtanh.f32 %v310_v8 }
 0x122   : > { %v584_v10 = vpop.eup %583 }
 0x123   : > { %518 = vmatpush3.xpose.msk.msra.mxu1 %vm239_vm1, %v584_v10 }
 0x126   : > { %520 = vmatmul.mubr.msk.f32.vlgmr.msra.gmra.mxu1 %vm239_vm1, %v314_v11 }
 0x1e6   : > { %v387_v12 = vpop.f32.mrf.mxu1 }
 0x1e7   : > { %v391_v13 = vmul.f32 0.17677669, %v387_v12 }
 0x1e8   : > { %v521_v14 = vpop.f32.mrf.mxu1 }
 0x1e9   : > { %393 = vst.msk [vmem:[%s226_s29] sm:$0x1] %vm392_vm2, %v391_v13 }
 0x1ea   : > { %652 = shalt.err (!%p649_p0)
}
 0x1eb   : > { %s653_s5 = scalar_lea.hbm %s871_s13, 16  ;;  %s657_s21 = scalar_lea.hbm %s912_s4, 32 }
 0x1ec   : > { %p654_p5 = scmp.ne.s32.totalorder %s871_s13, %s653_s5  ;;  %p658_p1 = scmp.lt.s32.totalorder %s871_s13, %s912_s4 }
 0x1ed   : > { %p659_p4 = scmp.lt.s32.totalorder %s657_s21, %s653_s5 }
 0x1ee   : > { %p655_p9 = pnand %p654_p5, %p928_p3 }
 0x1ef   : > { %p660_p6 = por %p659_p4, %p658_p1 }
 0x1f0   : > { %p656_p12 = pneg %p655_p9 }
 0x1f2   : > { %p661_p8 = pnand %p660_p6, %p656_p12 }
 0x1f4   : > { %664 = shalt.err (!%p661_p8)
}
 0x1f5   : > { %528 = dma.vmem_to_hbm [thread:$0]  (%p928_p3), %s408_s7, 16, %s871_s13, %s395_s11  }
 0x1f6 PF: > { %s419_s26 = sand.u32 1, %s695_s15   ;;  %p929_p11 = scmp.ne.s32.totalorder %s918_s22, 0 }
 0x1f7   : > { %p930_p7 = scmp.ge.s32.totalorder %s707_s18, 2  ;;  %s420_s28 = scalar_lea.sflag [#allocation4], %s419_s26 }
 0x1f9   : > { %p539_p10 = pnand %p930_p7, %p929_p11 }
 0x1fb   : > { %p540_p2 = pneg %p539_p10 }
 0x1fd   : > { %690 = dma.done.wait (%p540_p2), %s420_s28, 16  }
 0x1fe   : > { %692 = vsyncadd (%p540_p2), %s420_s28, 4294967280  ;;  %p18_p13 = scmp.ge.s32.totalorder %s795_s27, 4   ;;  %s931_s15 = smov %s699_s16 }
 0x1ff   : > { %s932_s16 = smov %s703_s17  ;;  %s933_s17 = smov %s812_s9 }
 0x200   : > { %s934_s18 = smov %s795_s27  ;;  %20 = sbr.rel (!%p18_p13) target bundleno = 6 (0x6), region = 85 }
 0x205   :  { %424 = vsyncpa [#allocation3], 1 }
 0x206   :  { %426 = vsyncpa [#allocation3 + $0x1], 1 }
 0x207   :  { %427 = vsyncpa [#allocation6], 1 }
 0x208   :  { %428 = vsyncpa [#allocation4], 1 }
 0x209   :  { %430 = vsyncpa [#allocation4 + $0x1], 1 }

</bundles_post_ra>
